<compile_context>
chip_gen: v7x
topology: tpu7x:2x2x1
jax: 0.10.0
libtpu: 0.0.40
codegen_flags: <defaults>
</compile_context>

<pallas_src>
import functools

import jax
import jax.numpy as jnp
from jax import lax
from jax.experimental import pallas as pl
from jax.experimental.pallas import tpu as pltpu

KERNEL = 5
EPS = 1e-5
_INV_SQRT2 = 0.7071067811865476


# --------------------------------------------------------------------------- #
# Fused kernel: one grid step == one (Conv -> BN(batch stats) -> GELU) layer.
# --------------------------------------------------------------------------- #
def _fused_cnn_kernel(x_ref, w_ref, beta_ref, o_ref, act_ref, *,
                      ksize, pad, w_spatial, feats):
    """x_ref:    (N, H, W*F)        lane-dense, channel-padded input (resident)
       w_ref:    (1, K*W*F, W*F)    bf16 expanded conv weights for THIS layer
       beta_ref: (1, 1, W*F)        BN beta for THIS layer (tiled across W)
       o_ref:    (N, H, W*F)        output (written only on the last layer)
       act_ref:  (N, H+2*pad, W*F)  persistent VMEM scratch (H-padded activation)
    """
    d = pl.program_id(0)
    last = pl.num_programs(0) - 1
    N, H, WC = x_ref.shape

    # ---- first layer only: zero just the H-halo rows, load x into the interior.
    @pl.when(d == 0)
    def _():
        act_ref[:, :pad, :] = jnp.zeros((N, pad, WC), jnp.float32)
        act_ref[:, pad + H:, :] = jnp.zeros((N, pad, WC), jnp.float32)
        # TODO(synk): could DMA x straight into the scratch interior with
        # memory_space=pl.ANY + make_async_copy; kept as a 16 KiB VMEM copy here.
        act_ref[:, pad:pad + H, :] = x_ref[...]

    # ---- Conv2d: all K row taps folded into ONE MXU contraction (depth K*WC).
    # The dx shift + channel contraction are pre-folded into the block-banded
    # weight matrix; the W halo ('same' padding) is baked in as zeros there.
    patch = jnp.concatenate(
        [act_ref[:, dy:dy + H, :].reshape(N * H, WC) for dy in range(ksize)],
        axis=1)                                                    # (N*H, K*WC)
    acc = jnp.dot(patch, w_ref[0].astype(jnp.float32),
                  preferred_element_type=jnp.float32)              # (N*H, WC) f32

    # ---- BatchNorm2d (batch statistics, gamma == 1): one-pass stats ----
    sums = jnp.concatenate([jnp.sum(acc, axis=0, keepdims=True),
                            jnp.sum(acc * acc, axis=0, keepdims=True)],
                           axis=0)                                 # (2, WC)
    # Lane butterfly: sums the W groups AND re-broadcasts per channel (XLU rolls).
    shift = feats
    while shift < WC:
        sums = sums + pltpu.roll(sums, shift=shift, axis=1)
        shift *= 2
    inv_cnt = jnp.float32(1.0 / (N * H * w_spatial))
    mean = sums[0:1, :] * inv_cnt
    var = sums[1:2, :] * inv_cnt - mean * mean                     # E[x^2] - mean^2
    y = (acc - mean) * lax.rsqrt(var + EPS) + beta_ref[0]

    # ---- exact GELU (erf form, nn.GELU default) ----
    out = 0.5 * y * (1.0 + lax.erf(y * jnp.float32(_INV_SQRT2)))

    @pl.when(d == last)
    def _():
        o_ref[...] = out.reshape(N, H, WC)

    @pl.when(d < last)
    def _():
        act_ref[:, pad:pad + H, :] = out.reshape(N, H, WC)

    # TODO(synk): BatchNorm running_mean/running_var buffer updates (training-time
    # side effects, not part of the forward output) are not materialized.


# --------------------------------------------------------------------------- #
# Hoisted weight preprocessing (run ONCE per parameter set, not per call):
# fold the dx shift + channel contraction into a block-banded (K*W*Cin, W*Cout)
# matrix per layer, stored in bf16.
# --------------------------------------------------------------------------- #
def _expand_conv_weights(w, w_spatial, pad, cin_pad):
    """(K, K, Cin, Cout) -> (K*W*cin_pad, W*Cout), W-halo zeros baked in."""
    K, _, cin, cout = w.shape
    if cin < cin_pad:
        w = jnp.pad(w, ((0, 0), (0, 0), (0, cin_pad - cin), (0, 0)))
    win = jnp.arange(w_spatial)[:, None]          # input column  w_in
    wout = jnp.arange(w_spatial)[None, :]         # output column w_out
    dx = win - wout + pad                         # tap index for this (w_in, w_out)
    valid = (dx >= 0) & (dx < K)
    dxc = jnp.clip(dx, 0, K - 1)
    g = w[:, dxc, :, :]                           # (K, W, W, Cin, Cout)
    g = jnp.where(valid[None, :, :, None, None], g, 0.0)
    g = jnp.transpose(g, (0, 1, 3, 2, 4))         # (K, W, Cin, W, Cout)
    return g.reshape(K * w_spatial * cin_pad, w_spatial * cout)


def prepare_params(params, w_spatial, kernel=KERNEL):
    """Expand conv weights (bf16) and tile BN betas. Call once per param set."""
    feats = params[0][0].shape[-1]
    cin0 = params[0][0].shape[2]
    if cin0 > feats:
        raise ValueError("fused kernel assumes in_channels <= features")
    WC = w_spatial * feats
    if WC % 128 != 0:
        raise ValueError("lane-dense layout requires W*features % 128 == 0")
    if w_spatial & (w_spatial - 1):
        raise ValueError("roll-butterfly BN reduction requires W to be a power of two")
    pad = kernel // 2
    wbig = jnp.stack(
        [_expand_conv_weights(w, w_spatial, pad, feats).astype(jnp.bfloat16)
         for (w, _b) in params])                                   # (D, K*WC, WC) bf16
    beta = jnp.stack([jnp.tile(b.astype(jnp.float32), w_spatial)[None, :]
                      for (_w, b) in params])                      # (D, 1, WC) f32
    return wbig, beta


# --------------------------------------------------------------------------- #
# Wrapper: NCHW in, NCHW out (PyTorch convention). Jit this.
# --------------------------------------------------------------------------- #
def cnn_interpretability_forward(x_nchw, wbig, beta, kernel=KERNEL):
    N, C, H, W = x_nchw.shape
    depth, KWC, WC = wbig.shape
    feats = WC // W
    pad = kernel // 2
    assert KWC == kernel * WC
    assert C <= feats

    # NCHW -> NHWC, pad input channels up to `feats`, flatten (W, C) into lanes.
    x = jnp.transpose(x_nchw, (0, 2, 3, 1)).astype(jnp.float32)
    x = jnp.pad(x, ((0, 0), (0, 0), (0, 0), (0, feats - C)))
    x = x.reshape(N, H, WC)

    kern = functools.partial(_fused_cnn_kernel, ksize=kernel, pad=pad,
                             w_spatial=W, feats=feats)

    out = pl.pallas_call(
        kern,
        out_shape=jax.ShapeDtypeStruct((N, H, WC), jnp.float32),
        grid=(depth,),
        in_specs=[
            pl.BlockSpec((N, H, WC), lambda d: (0, 0, 0)),    # x: resident, fetched once
            pl.BlockSpec((1, KWC, WC), lambda d: (d, 0, 0)),  # layer-d weights, streamed
            pl.BlockSpec((1, 1, WC), lambda d: (d, 0, 0)),    # layer-d beta
        ],
        out_specs=pl.BlockSpec((N, H, WC), lambda d: (0, 0, 0)),
        scratch_shapes=[pltpu.VMEM((N, H + 2 * pad, WC), jnp.float32)],
        compiler_params=pltpu.CompilerParams(
            dimension_semantics=("arbitrary",)),
    )(x, wbig, beta)

    out = out.reshape(N, H, W, feats)
    return jnp.transpose(out, (0, 3, 1, 2))                       # NHWC -> NCHW


# --------------------------------------------------------------------------- #
# Parameter init mirroring the module (conv: no bias; BN: gamma frozen at 1).
# --------------------------------------------------------------------------- #
def init_params(key, in_channels, features, depth, kernel):
    params = []
    cin = in_channels
    for _ in range(depth):
        key, wk, bk = jax.random.split(key, 3)
        w = 0.1 * jax.random.normal(wk, (kernel, kernel, cin, features),
                                    dtype=jnp.float32)
        beta = 0.1 * jax.random.normal(bk, (features,), dtype=jnp.float32)
        params.append((w, beta))   # gamma is identically 1 (batchnorm_onlybias=True)
        cin = features
    return params


# --------------------------------------------------------------------------- #
# Pure-JAX reference for validation.
# --------------------------------------------------------------------------- #
def _reference_forward(x_nchw, params, kernel=KERNEL):
    pad = kernel // 2
    x = jnp.transpose(x_nchw, (0, 2, 3, 1)).astype(jnp.float32)
    for (w, beta) in params:
        y = lax.conv_general_dilated(
            x, w, window_strides=(1, 1),
            padding=((pad, pad), (pad, pad)),
            dimension_numbers=("NHWC", "HWIO", "NHWC"),
            precision=lax.Precision.HIGHEST)
        mean = jnp.mean(y, axis=(0, 1, 2), keepdims=True)
        var = jnp.mean((y - mean) ** 2, axis=(0, 1, 2), keepdims=True)
        yn = (y - mean) * lax.rsqrt(var + EPS) + beta
        x = 0.5 * yn * (1.0 + lax.erf(yn * jnp.float32(_INV_SQRT2)))
    return jnp.transpose(x, (0, 3, 1, 2))


if __name__ == "__main__":
    # Small shapes consistent with the module: img_size=(C,H,W)=(4,16,16),
    # kernel=5, features=8, depth=3, batch=2.  W*features == 128 (lane-dense).
    C, H, W = 4, 16, 16
    FEATURES = 8
    DEPTH = 3
    N = 2

    key = jax.random.PRNGKey(0)
    key, xk = jax.random.split(key)
    x = jax.random.normal(xk, (N, C, H, W), dtype=jnp.float32)
    params = init_params(key, C, FEATURES, DEPTH, KERNEL)

    # Hoisted preprocessing: once per parameter set.
    wbig, beta = prepare_params(params, W, kernel=KERNEL)

    fwd = jax.jit(cnn_interpretability_forward)
    out = jax.block_until_ready(fwd(x, wbig, beta))

    assert out.shape == (N, FEATURES, H, W), out.shape
    assert bool(jnp.all(jnp.isfinite(out)))

    # (a) Kernel-logic check: reference using the SAME bf16-quantized weights
    #     (isolates the fused-kernel math from the deliberate storage cast).
    q_params = [(w.astype(jnp.bfloat16).astype(jnp.float32), b) for (w, b) in params]
    ref_q = jax.block_until_ready(_reference_forward(x, q_params))
    err_q = float(jnp.max(jnp.abs(out - ref_q)))
    assert err_q < 3e-3, f"max abs err vs bf16-weight reference: {err_q}"

    # (b) End-to-end check vs the exact f32 module; looser tolerance accounts for
    #     the bf16 weight-storage quantization (perf review item #1).
    ref = jax.block_until_ready(_reference_forward(x, params))
    err = float(jnp.max(jnp.abs(out - ref)))
    assert err < 2e-2, f"max abs err vs f32 reference: {err}"

    print("KERNEL_OK")
</pallas_src>

<mosaic_0001>
module attributes {stable_mosaic.version = 11 : i64} {
  func.func @_fused_cnn_kernel(%arg0: i32, %arg1: memref<2x16x128xf32, #tpu.memory_space<vmem>>, %arg2: memref<1x640x128xbf16, #tpu.memory_space<vmem>>, %arg3: memref<1x1x128xf32, #tpu.memory_space<vmem>>, %arg4: memref<2x16x128xf32, #tpu.memory_space<vmem>>, %arg5: memref<2x20x128xf32, #tpu.memory_space<vmem>>) attributes {dimension_semantics = [#tpu.dimension_semantics<arbitrary>], iteration_bounds = array<i64: 3>, scalar_prefetch = 0 : i64, scratch_operands = 1 : i64, tpu.core_type = #tpu.core_type<tc>, window_params = [{pipeline_mode = #tpu.pipeline_mode<synchronous>, transform_indices = @transform_0, window_bounds = array<i64: 2, 16, 128>}, {transform_indices = @transform_1, window_bounds = array<i64: 1, 640, 128>}, {transform_indices = @transform_2, window_bounds = array<i64: 1, 1, 128>}, {pipeline_mode = #tpu.pipeline_mode<synchronous>, transform_indices = @transform_3, window_bounds = array<i64: 2, 16, 128>}]} {
    %c0_i32 = arith.constant 0 : i32
    %0 = arith.cmpi eq, %arg0, %c0_i32 : i32
    %1 = arith.extui %0 : i1 to i32
    %c0_i32_0 = arith.constant 0 : i32
    %2 = arith.cmpi ne, %1, %c0_i32_0 : i32
    scf.if %2 {
      %cst_28 = arith.constant 0.000000e+00 : f32
      %65 = vector.broadcast %cst_28 : f32 to vector<2x2x128xf32>
      %c0_29 = arith.constant 0 : index
      %c0_30 = arith.constant 0 : index
      %c0_31 = arith.constant 0 : index
      %66 = vector.load %arg5[%c0_29, %c0_30, %c0_31] : memref<2x20x128xf32, #tpu.memory_space<vmem>>, vector<2x2x128xf32>
      tpu.vector_store %arg5[%c0_29, %c0_30, %c0_31], %65 {strides = array<i32>} : memref<2x20x128xf32, #tpu.memory_space<vmem>>, vector<2x2x128xf32>,
      %cst_32 = arith.constant 0.000000e+00 : f32
      %67 = vector.broadcast %cst_32 : f32 to vector<2x2x128xf32>
      %c0_33 = arith.constant 0 : index
      %c18 = arith.constant 18 : index
      %c0_34 = arith.constant 0 : index
      %68 = vector.load %arg5[%c0_33, %c18, %c0_34] : memref<2x20x128xf32, #tpu.memory_space<vmem>>, vector<2x2x128xf32>
      tpu.vector_store %arg5[%c0_33, %c18, %c0_34], %67 {strides = array<i32>} : memref<2x20x128xf32, #tpu.memory_space<vmem>>, vector<2x2x128xf32>,
      %c0_35 = arith.constant 0 : index
      %c0_36 = arith.constant 0 : index
      %c0_37 = arith.constant 0 : index
      %69 = vector.load %arg1[%c0_35, %c0_36, %c0_37] : memref<2x16x128xf32, #tpu.memory_space<vmem>>, vector<2x16x128xf32>
      %c0_38 = arith.constant 0 : index
      %c2_39 = arith.constant 2 : index
      %c0_40 = arith.constant 0 : index
      %70 = vector.load %arg5[%c0_38, %c2_39, %c0_40] : memref<2x20x128xf32, #tpu.memory_space<vmem>>, vector<2x16x128xf32>
      tpu.vector_store %arg5[%c0_38, %c2_39, %c0_40], %69 {strides = array<i32>} : memref<2x20x128xf32, #tpu.memory_space<vmem>>, vector<2x16x128xf32>,
    } else {
    }
    %c0 = arith.constant 0 : index
    %c0_1 = arith.constant 0 : index
    %c0_2 = arith.constant 0 : index
    %3 = vector.load %arg5[%c0, %c0_1, %c0_2] : memref<2x20x128xf32, #tpu.memory_space<vmem>>, vector<2x16x128xf32>
    %4 = vector.shape_cast %3 : vector<2x16x128xf32> to vector<32x128xf32>
    %c0_3 = arith.constant 0 : index
    %c1 = arith.constant 1 : index
    %c0_4 = arith.constant 0 : index
    %5 = vector.load %arg5[%c0_3, %c1, %c0_4] : memref<2x20x128xf32, #tpu.memory_space<vmem>>, vector<2x16x128xf32>
    %6 = vector.shape_cast %5 : vector<2x16x128xf32> to vector<32x128xf32>
    %c0_5 = arith.constant 0 : index
    %c2 = arith.constant 2 : index
    %c0_6 = arith.constant 0 : index
    %7 = vector.load %arg5[%c0_5, %c2, %c0_6] : memref<2x20x128xf32, #tpu.memory_space<vmem>>, vector<2x16x128xf32>
    %8 = vector.shape_cast %7 : vector<2x16x128xf32> to vector<32x128xf32>
    %c0_7 = arith.constant 0 : index
    %c3 = arith.constant 3 : index
    %c0_8 = arith.constant 0 : index
    %9 = vector.load %arg5[%c0_7, %c3, %c0_8] : memref<2x20x128xf32, #tpu.memory_space<vmem>>, vector<2x16x128xf32>
    %10 = vector.shape_cast %9 : vector<2x16x128xf32> to vector<32x128xf32>
    %c0_9 = arith.constant 0 : index
    %c4 = arith.constant 4 : index
    %c0_10 = arith.constant 0 : index
    %11 = vector.load %arg5[%c0_9, %c4, %c0_10] : memref<2x20x128xf32, #tpu.memory_space<vmem>>, vector<2x16x128xf32>
    %12 = vector.shape_cast %11 : vector<2x16x128xf32> to vector<32x128xf32>
    %13 = tpu.concatenate %4, %6, %8, %10, %12 in 1 : vector<32x128xf32>, vector<32x128xf32>, vector<32x128xf32>, vector<32x128xf32>, vector<32x128xf32> -> vector<32x640xf32>
    %c0_11 = arith.constant 0 : index
    %c0_12 = arith.constant 0 : index
    %c0_13 = arith.constant 0 : index
    %14 = vector.load %arg2[%c0_11, %c0_12, %c0_13] : memref<1x640x128xbf16, #tpu.memory_space<vmem>>, vector<1x640x128xbf16>
    %15 = vector.shape_cast %14 : vector<1x640x128xbf16> to vector<640x128xbf16>
    %16 = arith.extf %15 : vector<640x128xbf16> to vector<640x128xf32>
    %cst = arith.constant dense<0.000000e+00> : vector<32x128xf32>
    %17 = tpu.matmul %13, %16, %cst {dimension_numbers = #tpu.dot_dimension_numbers<[1], [0], [0], [1], [0, 0, 1, 1], [], []>} : vector<32x640xf32>, vector<640x128xf32>, vector<32x128xf32> -> vector<32x128xf32>
    %cst_14 = arith.constant dense<0.000000e+00> : vector<128xf32>
    %18 = vector.multi_reduction <add>, %17, %cst_14 [0] : vector<32x128xf32> to vector<128xf32>
    %19 = vector.shape_cast %18 : vector<128xf32> to vector<1x128xf32>
    %20 = arith.mulf %17, %17 : vector<32x128xf32>
    %cst_15 = arith.constant dense<0.000000e+00> : vector<128xf32>
    %21 = vector.multi_reduction <add>, %20, %cst_15 [0] : vector<32x128xf32> to vector<128xf32>
    %22 = vector.shape_cast %21 : vector<128xf32> to vector<1x128xf32>
    %23 = tpu.concatenate %19, %22 in 0 : vector<1x128xf32>, vector<1x128xf32> -> vector<2x128xf32>
    %c8_i32 = arith.constant 8 : i32
    %24 = tpu.dynamic_rotate %23 by %c8_i32 dim 1 : vector<2x128xf32>, i32 -> vector<2x128xf32>
    %25 = arith.addf %23, %24 : vector<2x128xf32>
    %c16_i32 = arith.constant 16 : i32
    %26 = tpu.dynamic_rotate %25 by %c16_i32 dim 1 : vector<2x128xf32>, i32 -> vector<2x128xf32>
    %27 = arith.addf %25, %26 : vector<2x128xf32>
    %c32_i32 = arith.constant 32 : i32
    %28 = tpu.dynamic_rotate %27 by %c32_i32 dim 1 : vector<2x128xf32>, i32 -> vector<2x128xf32>
    %29 = arith.addf %27, %28 : vector<2x128xf32>
    %c64_i32 = arith.constant 64 : i32
    %30 = tpu.dynamic_rotate %29 by %c64_i32 dim 1 : vector<2x128xf32>, i32 -> vector<2x128xf32>
    %31 = arith.addf %29, %30 : vector<2x128xf32>
    %32 = vector.extract_strided_slice %31 {offsets = [0, 0], sizes = [1, 128], strides = [1, 1]} : vector<2x128xf32> to vector<1x128xf32>
    %cst_16 = arith.constant 0.001953125 : f32
    %33 = vector.broadcast %cst_16 : f32 to vector<1x128xf32>
    %34 = arith.mulf %32, %33 : vector<1x128xf32>
    %35 = vector.extract_strided_slice %31 {offsets = [1, 0], sizes = [1, 128], strides = [1, 1]} : vector<2x128xf32> to vector<1x128xf32>
    %cst_17 = arith.constant 0.001953125 : f32
    %36 = vector.broadcast %cst_17 : f32 to vector<1x128xf32>
    %37 = arith.mulf %35, %36 : vector<1x128xf32>
    %38 = arith.mulf %34, %34 : vector<1x128xf32>
    %39 = arith.subf %37, %38 : vector<1x128xf32>
    %40 = vector.broadcast %34 : vector<1x128xf32> to vector<32x128xf32>
    %41 = arith.subf %17, %40 : vector<32x128xf32>
    %cst_18 = arith.constant 9.99999974E-6 : f32
    %42 = vector.broadcast %cst_18 : f32 to vector<1x128xf32>
    %43 = arith.addf %39, %42 : vector<1x128xf32>
    %44 = math.rsqrt %43 : vector<1x128xf32>
    %45 = vector.broadcast %44 : vector<1x128xf32> to vector<32x128xf32>
    %46 = arith.mulf %41, %45 : vector<32x128xf32>
    %c0_19 = arith.constant 0 : index
    %c0_20 = arith.constant 0 : index
    %c0_21 = arith.constant 0 : index
    %47 = vector.load %arg3[%c0_19, %c0_20, %c0_21] : memref<1x1x128xf32, #tpu.memory_space<vmem>>, vector<1x1x128xf32>
    %48 = vector.shape_cast %47 : vector<1x1x128xf32> to vector<1x128xf32>
    %49 = vector.broadcast %48 : vector<1x128xf32> to vector<32x128xf32>
    %50 = arith.addf %46, %49 : vector<32x128xf32>
    %cst_22 = arith.constant 5.000000e-01 : f32
    %51 = vector.broadcast %cst_22 : f32 to vector<32x128xf32>
    %52 = arith.mulf %51, %50 : vector<32x128xf32>
    %cst_23 = arith.constant 0.707106769 : f32
    %53 = vector.broadcast %cst_23 : f32 to vector<32x128xf32>
    %54 = arith.mulf %50, %53 : vector<32x128xf32>
    %55 = math.erf %54 : vector<32x128xf32>
    %cst_24 = arith.constant 1.000000e+00 : f32
    %56 = vector.broadcast %cst_24 : f32 to vector<32x128xf32>
    %57 = arith.addf %56, %55 : vector<32x128xf32>
    %58 = arith.mulf %52, %57 : vector<32x128xf32>
    %c2_i32 = arith.constant 2 : i32
    %59 = arith.cmpi eq, %arg0, %c2_i32 : i32
    %60 = arith.extui %59 : i1 to i32
    %c0_i32_25 = arith.constant 0 : i32
    %61 = arith.cmpi ne, %60, %c0_i32_25 : i32
    scf.if %61 {
      %65 = vector.shape_cast %58 : vector<32x128xf32> to vector<2x16x128xf32>
      %c0_28 = arith.constant 0 : index
      %c0_29 = arith.constant 0 : index
      %c0_30 = arith.constant 0 : index
      %66 = vector.load %arg4[%c0_28, %c0_29, %c0_30] : memref<2x16x128xf32, #tpu.memory_space<vmem>>, vector<2x16x128xf32>
      tpu.vector_store %arg4[%c0_28, %c0_29, %c0_30], %65 {strides = array<i32>} : memref<2x16x128xf32, #tpu.memory_space<vmem>>, vector<2x16x128xf32>,
    } else {
    }
    %c2_i32_26 = arith.constant 2 : i32
    %62 = arith.cmpi slt, %arg0, %c2_i32_26 : i32
    %63 = arith.extui %62 : i1 to i32
    %c0_i32_27 = arith.constant 0 : i32
    %64 = arith.cmpi ne, %63, %c0_i32_27 : i32
    scf.if %64 {
      %65 = vector.shape_cast %58 : vector<32x128xf32> to vector<2x16x128xf32>
      %c0_28 = arith.constant 0 : index
      %c2_29 = arith.constant 2 : index
      %c0_30 = arith.constant 0 : index
      %66 = vector.load %arg5[%c0_28, %c2_29, %c0_30] : memref<2x20x128xf32, #tpu.memory_space<vmem>>, vector<2x16x128xf32>
      tpu.vector_store %arg5[%c0_28, %c2_29, %c0_30], %65 {strides = array<i32>} : memref<2x20x128xf32, #tpu.memory_space<vmem>>, vector<2x16x128xf32>,
    } else {
    }
    return
  }
  func.func @transform_0(%arg0: i32) -> (i32, i32, i32) {
    %c0_i32 = arith.constant 0 : i32
    %c0_i32_0 = arith.constant 0 : i32
    %c0_i32_1 = arith.constant 0 : i32
    %c0_i32_2 = arith.constant 0 : i32
    return %c0_i32, %c0_i32_0, %c0_i32_1 : i32, i32, i32
  }
  func.func @transform_1(%arg0: i32) -> (i32, i32, i32) {
    %c0_i32 = arith.constant 0 : i32
    %c0_i32_0 = arith.constant 0 : i32
    %c0_i32_1 = arith.constant 0 : i32
    return %arg0, %c0_i32, %c0_i32_0 : i32, i32, i32
  }
  func.func @transform_2(%arg0: i32) -> (i32, i32, i32) {
    %c0_i32 = arith.constant 0 : i32
    %c0_i32_0 = arith.constant 0 : i32
    %c0_i32_1 = arith.constant 0 : i32
    return %arg0, %c0_i32, %c0_i32_0 : i32, i32, i32
  }
  func.func @transform_3(%arg0: i32) -> (i32, i32, i32) {
    %c0_i32 = arith.constant 0 : i32
    %c0_i32_0 = arith.constant 0 : i32
    %c0_i32_1 = arith.constant 0 : i32
    %c0_i32_2 = arith.constant 0 : i32
    return %c0_i32, %c0_i32_0, %c0_i32_1 : i32, i32, i32
  }
}

</mosaic_0001>

<bundles_post_ra>
// kernel: cnn_interpretability_forward.1
= control target key start
LH: loop header
LB: loop body
LE: loop exit
PB: predicated region body
PF: predicated region fallthrough
CT: control target
= control target key end

     0   :  { %8 = vsyncpa [#allocation4], 0  ;;  %s1614_s0 = inlined_call_operand.vmem [shape: f32[2,16,128], index: 0, kind: input, shape index: {}]   ;;  %s1615_s1 = inlined_call_operand.hbm [shape: bf16[3,640,128], index: 1, kind: input, shape index: {}]   ;;  %s1616_s2 = inlined_call_operand.vmem [shape: f32[3,1,128], index: 2, kind: input, shape index: {}]   ;;  %s1617_s3 = inlined_call_operand.vmem [shape: f32[2,16,128], index: 3, kind: output, shape index: {}]  }
   0x1   :  { %10 = vsyncpa [#allocation4 + $0x1], 0  ;;  %s1417_s12 = smov 0   ;;  %s1419_s13 = smov 0  }
   0x2   :  { %s1421_s14 = smov 0   ;;  %s1423_s15 = smov 0  }
   0x3 LB: > { %s1436_s16 = sadd.s32 4294967295, %s1387_s15   ;;  %s1439_s17 = sadd.s32 1, %s1387_s15   ;;  %s1387_s15 = sphi %s1423_s15, %s1624_s15   ;;  %s1383_s14 = sphi %s1421_s14, %s1623_s14   ;;  %s1379_s13 = sphi %s1419_s13, %s1622_s13   ;;  %s1375_s12 = sphi %s1417_s12, %s1621_s12  }
   0x4   : > { %s41_s18 = ssub.s32 %s1387_s15, %s1439_s17  ;;  %s44_s19 = sadd.s32 1, %s1383_s14 }
   0x5   : > { %p42_p0 = scmp.eq.s32.totalorder %s41_s18, 0  ;;  %p51_p1 = scmp.ne.s32.totalorder %s1383_s14, %s1379_s13 }
   0x6   : > { %p52_p2 = scmp.eq.s32.totalorder %s1387_s15, 0  ;;  %p57_p3 = scmp.ne.s32.totalorder %s1379_s13, %s1375_s12 }
   0x7   : > { %s1449_s20 = scalar_select %p42_p0, %s1383_s14, %s44_s19  }
   0x8   : > { %p53_p4 = por %p52_p2, %p51_p1  ;;  %p58_p5 = scmp.eq.s32.totalorder %s1436_s16, 0 }
   0x9   : > { %p1273_p6 = scmp.lt.s32.totalorder %s1387_s15, 3  ;;  %s131_s22 = sand.u32 1, %s1383_s14  }
   0xa   : > { %p1453_p7 = por %p58_p5, %p57_p3  ;;  %s1264_s23 = smul.u32 320, %s131_s22 }
   0xb   : > { %s1265_s24 = smul.u32 5120, %s1387_s15  ;;  %p1459_p8 = pnand %p1273_p6, %p53_p4 }
   0xc   : > { %s135_s29 = scalar_lea.vmem [#allocation3], %s1264_s23  ;;  %s1471_s4 = scalar_lea.sflag [#allocation4], %s131_s22 }
   0xd   : > { %s1466_s28 = scalar_lea.hbm %s1615_s1, %s1265_s24  ;;  %s142_s30 = sshll.u32 %s135_s29, 4  ;;  %s1468_s30 = int_to_ptr.vmem [resolvable:$true] %s142_s30 }
   0xe   : > { %s1323_s5 = scalar_lea.hbm %s1466_s28, 5120  ;;  %p1325_p11 = pneg %p1459_p8 }
   0xf   : > { %p1324_p10 = scmp.ne.s32.totalorder %s1466_s28, %s1323_s5  ;;  %s1328_s8 = scalar_lea.hbm %s1615_s1, 15360 }
  0x10   : > { %p1329_p0 = scmp.lt.u32.totalorder %s1466_s28, %s1615_s1  ;;  %p1330_p1 = scmp.lt.u32.totalorder %s1328_s8, %s1323_s5 }
  0x11   : > { %p1326_p12 = pnand %p1325_p11, %p1324_p10  ;;  %p1332_p3 = scmp.lt.u32.totalorder %s1323_s5, %s1466_s28 }
  0x12   : > { %p1331_p2 = por %p1330_p1, %p1329_p0 }
  0x13   : > { %p1327_p13 = pneg %p1326_p12 }
  0x14   : > { %p1333_p4 = por %p1332_p3, %p1331_p2 }
  0x16   : > { %p1334_p5 = pnand %p1333_p4, %p1327_p13 }
  0x18   : > { %1337 = shalt.err (!%p1334_p5)
}
  0x19   : > { %s1338_s11 = scalar_lea.vmem %s1468_s30, 5120  ;;  %s1389_s12 = smov [#allocation3]  }
  0x1a   : > { %p1339_p6 = scmp.ne.s32.totalorder %s1468_s30, %s1338_s11  ;;  %s1343_s18 = sshll.u32 %s1389_s12, 4  ;;  %s1344_s18 = int_to_ptr.vmem [resolvable:$false] %s1343_s18 }
  0x1b   : > { %s1345_s19 = scalar_lea.vmem %s1344_s18, 10240  ;;  %p1346_p9 = scmp.lt.s32.totalorder %s1468_s30, %s1344_s18 }
  0x1c   : > { %p1341_p10 = pnand %p1339_p6, %p1325_p11  ;;  %p1347_p0 = scmp.lt.s32.totalorder %s1345_s19, %s1338_s11 }
  0x1e   : > { %p1342_p12 = pneg %p1341_p10  ;;  %p1348_p1 = por %p1347_p0, %p1346_p9 }
  0x20   : > { %p1349_p2 = pnand %p1348_p1, %p1342_p12 }
  0x22   : > { %1352 = shalt.err (!%p1349_p2)
}
  0x23   : > { %s1390_s22 = smov 64   ;;  %s1391_s23 = smov 4  }
  0x24   : > { %1272 = dma.hbm_to_vmem [thread:$0]  (!%p1459_p8), %s1466_s28, 5120, %s1468_s30, %s1471_s4, %s1390_s22, %s1390_s22, %s1391_s23  }
  0x25   : > { %p156_p11 = scmp.lt.s32.totalorder %s1387_s15, 4  ;;  %p1620_p13 = scmp.ge.s32.totalorder %s1387_s15, 1 }
  0x27   : > { %p157_p3 = pnand %p1620_p13, %p156_p11 }
  0x28   : > { %s162_s24 = sand.u32 (!%p157_p3), 1, %s1379_s13  }
  0x29   : > { %160 = sbr.rel (%p157_p3) target bundleno = 886 (0x376), region = 32  ;;  %s163_s27 = scalar_lea.sflag (!%p157_p3), [#allocation4], %s162_s24 }
  0x2a   : > { %s1266_s26 = smul.u32 (!%p157_p3), 320, %s162_s24 }
  0x2c   : > { %s1503_s29 = scalar_lea.vmem (!%p157_p3), [#allocation3], %s1266_s26 }
  0x30   : > { %1370 = dma.done.wait (%p1453_p7), %s163_s27, 5120  }
  0x31   : > { %1372 = vsyncadd (%p1453_p7), %s163_s27, 4294962176  ;;  %p187_p9 = scmp.lt.s32.totalorder %s1436_s16, 2  ;;  %p801_p8 = scmp.ne.s32.totalorder %s1436_s16, 0 }
  0x32   : > { %v198_v0 = vld [vmem:[%s1614_s0] sm:$0xff] (!%p801_p8)  ;;  %v199_v1 = vld [vmem:[%s1614_s0 + $0x8] sm:$0xff] (!%p801_p8)  ;;  %v200_v2 = vld [vmem:[%s1614_s0 + $0x10] sm:$0xff] (!%p801_p8)  ;;  %v1392_v3 = vmov (!%p801_p8), 0.0  }
  0x33   : > { %s1511_s25 = scalar_select %p187_p9, %s1436_s16, 2 }
  0x34   : > { %193 = sbr.rel (%p801_p8) target bundleno = 59 (0x3b), region = 40  ;;  %194 = vst [vmem:[#allocation2] sm:$0x3] (!%p801_p8), %v1392_v3  ;;  %195 = vst [vmem:[#allocation2 + $0x18] sm:$0x3] (!%p801_p8), %v1392_v3  ;;  %v201_v4 = vld [vmem:[%s1614_s0 + $0x18] sm:$0xff] (!%p801_p8) }
  0x35   : > { %s189_s30 = scalar_lea.vmem %s1616_s2, %s1511_s25  ;;  %196 = vst [vmem:[#allocation2 + $0x12] sm:$0x3] (!%p801_p8), %v1392_v3  ;;  %197 = vst [vmem:[#allocation2 + $0x2a] sm:$0x3] (!%p801_p8), %v1392_v3 }
  0x36   : > { %202 = vst [vmem:[#allocation2 + $0x2] sm:$0xff] (!%p801_p8), %v198_v0  ;;  %203 = vst [vmem:[#allocation2 + $0xa] sm:$0xff] (!%p801_p8), %v199_v1 }
  0x37   : > { %204 = vst [vmem:[#allocation2 + $0x1a] sm:$0xff] (!%p801_p8), %v200_v2  ;;  %205 = vst [vmem:[#allocation2 + $0x22] sm:$0xff] (!%p801_p8), %v201_v4 }
  0x3b PF: > { %v974_v5 = vld [vmem:[%s1503_s29 + $0x40] sm:$0xff]   ;;  %v975_v9 = vld [vmem:[%s1503_s29 + $0x48] sm:$0xff]   ;;  %v976_v13 = vld [vmem:[%s1503_s29 + $0x50] sm:$0xff]   ;;  %vm663_vm0 = vcmask 1040384   ;;  %s1393_s11 = smov 8   ;;  %s1394_s12 = smov 16  }
  0x3c   : > { %v990_v6 = vld [vmem:[%s1503_s29 + $0xc0] sm:$0xff]   ;;  %1153 = vmatprep.subr.bf16.mxu0 %v974_v5  ;;  %v991_v10 = vld [vmem:[%s1503_s29 + $0xc8] sm:$0xff]   ;;  %v992_v14 = vld [vmem:[%s1503_s29 + $0xd0] sm:$0xff]   ;;  %s1395_s18 = smov 32   ;;  %s1396_s19 = smov 64  }
  0x3d   : > { %v808_v7 = vld [vmem:[%s1503_s29] sm:$0xff]   ;;  %1185 = vmatprep.subr.bf16.mxu1 %v990_v6  ;;  %v967_v11 = vld [vmem:[%s1503_s29 + $0x8] sm:$0xff]   ;;  %v968_v15 = vld [vmem:[%s1503_s29 + $0x10] sm:$0xff]   ;;  %p803_p7 = scmp.ne.s32.totalorder %s1436_s16, 2 }
  0x3e   : > { %v982_v8 = vld [vmem:[%s1503_s29 + $0x80] sm:$0xff]   ;;  %1155 = vmatpush3.bf16.msra.mxu0 %v808_v7  ;;  %v983_v12 = vld [vmem:[%s1503_s29 + $0x88] sm:$0xff]   ;;  %v984_v16 = vld [vmem:[%s1503_s29 + $0x90] sm:$0xff]  }
  0x3f   : > { %1187 = vmatpush3.bf16.msra.mxu1 %v982_v8  ;;  %1157 = vmatprep.subr.bf16.mxu0 %v975_v9  ;;  %v977_v17 = vld [vmem:[%s1503_s29 + $0x58] sm:$0xff]   ;;  %v978_v23 = vld [vmem:[%s1503_s29 + $0x60] sm:$0xff]   ;;  %v979_v27 = vld [vmem:[%s1503_s29 + $0x68] sm:$0xff]  }
  0x40   : > { %1189 = vmatprep.subr.bf16.mxu1 %v991_v10  ;;  %v993_v18 = vld [vmem:[%s1503_s29 + $0xd8] sm:$0xff]   ;;  %v994_v24 = vld [vmem:[%s1503_s29 + $0xe0] sm:$0xff]   ;;  %v995_v28 = vld [vmem:[%s1503_s29 + $0xe8] sm:$0xff]  }
  0x41   : > { %v210_v19 = vld [vmem:[#allocation2 + $0x1] sm:$0xff]  ;;  %v970_v25 = vld [vmem:[%s1503_s29 + $0x20] sm:$0xff]   ;;  %v971_v29 = vld [vmem:[%s1503_s29 + $0x28] sm:$0xff]  }
  0x42   : > { %1159 = vmatpush3.bf16.msra.mxu0 %v967_v11  ;;  %v969_v20 = vld [vmem:[%s1503_s29 + $0x18] sm:$0xff]   ;;  %450 = vmatprep.mubr.f32.mxu0 %v210_v19  ;;  %v986_v26 = vld [vmem:[%s1503_s29 + $0xa0] sm:$0xff]   ;;  %v987_v30 = vld [vmem:[%s1503_s29 + $0xa8] sm:$0xff]  }
  0x43   : > { %1191 = vmatpush3.bf16.msra.mxu1 %v983_v12  ;;  %1161 = vmatprep.subr.bf16.mxu0 %v976_v13  ;;  %v985_v21 = vld [vmem:[%s1503_s29 + $0x98] sm:$0xff]   ;;  %v980_v31 = vld [vmem:[%s1503_s29 + $0x70] sm:$0xff]   ;;  %v998_v39 = vld [vmem:[%s1503_s29 + $0x100] sm:$0xff]  }
  0x44   : > { %1193 = vmatprep.subr.bf16.mxu1 %v992_v14  ;;  %v218_v22 = vld [vmem:[#allocation2 + $0x3] sm:$0xff]  ;;  %v999_v42 = vld [vmem:[%s1503_s29 + $0x108] sm:$0xff]   ;;  %v219_v44 = vld [vmem:[#allocation2 + $0xb] sm:$0xff] }
  0x45   : > { %535 = vmatprep.mubr.f32.mxu1 %v218_v22  ;;  %v996_v32 = vld [vmem:[%s1503_s29 + $0xf0] sm:$0xff]   ;;  %v981_v35 = vld [vmem:[%s1503_s29 + $0x78] sm:$0xff]   ;;  %v208_v50 = vld [vmem:[#allocation2 + $0x18] sm:$0xff] }
  0x46   : > { %1163 = vmatpush3.bf16.msra.mxu0 %v968_v15  ;;  %v972_v33 = vld [vmem:[%s1503_s29 + $0x30] sm:$0xff]   ;;  %v997_v36 = vld [vmem:[%s1503_s29 + $0xf8] sm:$0xff]   ;;  %v1002_v57 = vld [vmem:[%s1503_s29 + $0x120] sm:$0xff]  }
  0x47   : > { %1195 = vmatpush3.bf16.msra.mxu1 %v984_v16  ;;  %1165 = vmatprep.subr.bf16.mxu0 %v977_v17  ;;  %v988_v34 = vld [vmem:[%s1503_s29 + $0xb0] sm:$0xff]   ;;  %v973_v37 = vld [vmem:[%s1503_s29 + $0x38] sm:$0xff]   ;;  %v1003_v60 = vld [vmem:[%s1503_s29 + $0x128] sm:$0xff]  }
  0x48   : > { %1197 = vmatprep.subr.bf16.mxu1 %v993_v18  ;;  %v989_v38 = vld [vmem:[%s1503_s29 + $0xb8] sm:$0xff]   ;;  %v206_v40 = vld [vmem:[#allocation2] sm:$0xff] }
  0x49   : > { %v214_v41 = vld [vmem:[#allocation2 + $0x2] sm:$0xff]  ;;  %v215_v46 = vld [vmem:[#allocation2 + $0xa] sm:$0xff]  ;;  %v212_v48 = vld [vmem:[#allocation2 + $0x19] sm:$0xff] }
  0x4a   : > { %1167 = vmatpush3.bf16.msra.mxu0 %v969_v20  ;;  %v211_v43 = vld [vmem:[#allocation2 + $0x9] sm:$0xff]  ;;  %v1000_v47 = vld [vmem:[%s1503_s29 + $0x110] sm:$0xff]  }
  0x4b   : > { %1199 = vmatpush3.bf16.msra.mxu1 %v985_v21  ;;  %1169 = vmatprep.subr.bf16.mxu0 %v978_v23  ;;  %v207_v45 = vld [vmem:[#allocation2 + $0x8] sm:$0xff]  ;;  %v220_v49 = vld [vmem:[#allocation2 + $0x1b] sm:$0xff] }
  0x4c   : > { %1201 = vmatprep.subr.bf16.mxu1 %v994_v24  ;;  %v216_v51 = vld [vmem:[#allocation2 + $0x1a] sm:$0xff]  ;;  %v1001_v52 = vld [vmem:[%s1503_s29 + $0x118] sm:$0xff]  }
  0x4d   : > { %v213_v53 = vld [vmem:[#allocation2 + $0x21] sm:$0xff]  ;;  %v223_v63 = vld [vmem:[#allocation2 + $0xc] sm:$0xff] }
  0x4e   : > { %1171 = vmatpush3.bf16.msra.mxu0 %v970_v25  ;;  %v221_v54 = vld [vmem:[#allocation2 + $0x23] sm:$0xff] }
  0x4f   : > { %1203 = vmatpush3.bf16.msra.mxu1 %v986_v26  ;;  %1173 = vmatprep.subr.bf16.mxu0 %v979_v27  ;;  %v209_v55 = vld [vmem:[#allocation2 + $0x20] sm:$0xff]  ;;  %v1005_v62 = vld [vmem:[%s1503_s29 + $0x138] sm:$0xff]  }
  0x50   : > { %1205 = vmatprep.subr.bf16.mxu1 %v995_v28  ;;  %v217_v56 = vld [vmem:[#allocation2 + $0x22] sm:$0xff] }
  0x51   : > { %v222_v58 = vld [vmem:[#allocation2 + $0x4] sm:$0xff]  ;;  %v224_v59 = vld [vmem:[#allocation2 + $0x1c] sm:$0xff] }
  0x52   : > { %1175 = vmatpush3.bf16.msra.mxu0 %v971_v29  ;;  %v1004_v61 = vld [vmem:[%s1503_s29 + $0x130] sm:$0xff]  }
  0x53   : > { %1207 = vmatpush3.bf16.msra.mxu1 %v987_v30  ;;  %1177 = vmatprep.subr.bf16.mxu0 %v980_v31  ;;  %v225_v0 = vld [vmem:[#allocation2 + $0x24] sm:$0xff] }
  0x54   : > { %1209 = vmatprep.subr.bf16.mxu1 %v996_v32 }
  0x56   : > { %1179 = vmatpush3.bf16.msra.mxu0 %v972_v33 }
  0x57   : > { %1211 = vmatpush3.bf16.msra.mxu1 %v988_v34  ;;  %1181 = vmatprep.subr.bf16.mxu0 %v981_v35 }
  0x58   : > { %1213 = vmatprep.subr.bf16.mxu1 %v997_v36 }
  0x5a   : > { %1183 = vmatpush3.bf16.msra.mxu0 %v973_v37 }
  0x5b   : > { %1215 = vmatpush3.bf16.msra.mxu1 %v989_v38  ;;  %1217 = vmatprep.subr.bf16.mxu0 %v998_v39 }
  0x5c   : > { %1248 = vmatprep.subr.bf16.mxu1 %v998_v39 }
  0x5d   : > { %451 = vmatmul.mubr.f32.vlgmr.msra.gmra.mrb[0].mxu0 %v206_v40 }
  0x5e   : > { %536 = vmatmul.mubr.f32.vlgmr.msra.gmra.mrb[0].mxu1 %v214_v41  ;;  %1219 = vmatpush3.bf16.msra.mxu0 %v998_v39 }
  0x5f   : > { %1256 = vmatpush3.bf16.msra.mxu1 %v998_v39  ;;  %1221 = vmatprep.subr.bf16.mxu0 %v999_v42 }
  0x60   : > { %1249 = vmatprep.subr.bf16.mxu1 %v999_v42  ;;  %455 = vmatprep.mubr.f32.mxu0 %v211_v43 }
  0x61   : > { %540 = vmatprep.mubr.f32.mxu1 %v219_v44  ;;  %456 = vmatmul.mubr.f32.gmra.mrb[2].mxu0 %v207_v45 }
  0x62   : > { %541 = vmatmul.mubr.f32.gmra.mrb[2].mxu1 %v215_v46  ;;  %1223 = vmatpush3.bf16.msra.mxu0 %v999_v42 }
  0x63   : > { %1257 = vmatpush3.bf16.msra.mxu1 %v999_v42  ;;  %1225 = vmatprep.subr.bf16.mxu0 %v1000_v47 }
  0x64   : > { %1250 = vmatprep.subr.bf16.mxu1 %v1000_v47  ;;  %460 = vmatprep.mubr.f32.mxu0 %v212_v48 }
  0x65   : > { %545 = vmatprep.mubr.f32.mxu1 %v220_v49  ;;  %461 = vmatmul.mubr.f32.gmra.mrb[4].mxu0 %v208_v50 }
  0x66   : > { %546 = vmatmul.mubr.f32.gmra.mrb[4].mxu1 %v216_v51  ;;  %1227 = vmatpush3.bf16.msra.mxu0 %v1000_v47 }
  0x67   : > { %1258 = vmatpush3.bf16.msra.mxu1 %v1000_v47  ;;  %1229 = vmatprep.subr.bf16.mxu0 %v1001_v52 }
  0x68   : > { %1251 = vmatprep.subr.bf16.mxu1 %v1001_v52  ;;  %465 = vmatprep.mubr.f32.mxu0 %v213_v53 }
  0x69   : > { %550 = vmatprep.mubr.f32.mxu1 %v221_v54  ;;  %466 = vmatmul.mubr.f32.gmra.mrb[6].mxu0 %v209_v55 }
  0x6a   : > { %551 = vmatmul.mubr.f32.gmra.mrb[6].mxu1 %v217_v56  ;;  %1231 = vmatpush3.bf16.msra.mxu0 %v1001_v52 }
  0x6b   : > { %1259 = vmatpush3.bf16.msra.mxu1 %v1001_v52  ;;  %1233 = vmatprep.subr.bf16.mxu0 %v1002_v57 }
  0x6c   : > { %1252 = vmatprep.subr.bf16.mxu1 %v1002_v57  ;;  %1146 = vmatprep.mubr.f32.mxu0 %v222_v58 }
  0x6d   : > { %1149 = vmatprep.mubr.f32.mxu1 %v224_v59 }
  0x6e   : > { %1235 = vmatpush3.bf16.msra.mxu0 %v1002_v57 }
  0x6f   : > { %1260 = vmatpush3.bf16.msra.mxu1 %v1002_v57  ;;  %1237 = vmatprep.subr.bf16.mxu0 %v1003_v60 }
  0x70   : > { %1253 = vmatprep.subr.bf16.mxu1 %v1003_v60 }
  0x72   : > { %1239 = vmatpush3.bf16.msra.mxu0 %v1003_v60 }
  0x73   : > { %1261 = vmatpush3.bf16.msra.mxu1 %v1003_v60  ;;  %1241 = vmatprep.subr.bf16.mxu0 %v1004_v61 }
  0x74   : > { %1254 = vmatprep.subr.bf16.mxu1 %v1004_v61 }
  0x76   : > { %1243 = vmatpush3.bf16.msra.mxu0 %v1004_v61 }
  0x77   : > { %1262 = vmatpush3.bf16.msra.mxu1 %v1004_v61  ;;  %1245 = vmatprep.subr.bf16.mxu0 %v1005_v62 }
  0x78   : > { %1255 = vmatprep.subr.bf16.mxu1 %v1005_v62 }
  0x7a   : > { %1247 = vmatpush3.bf16.msra.mxu0 %v1005_v62 }
  0x7b   : > { %1263 = vmatpush3.bf16.msra.mxu1 %v1005_v62 }
  0x7d   : > { %1147 = vmatmul.mubr.f32.vlgmr.msra.gmra.mrb[8].mxu0 %v223_v63 }
  0x7e   : > { %1150 = vmatmul.mubr.f32.vlgmr.msra.gmra.mrb[8].mxu1 %v225_v0 }
 0x130   : > { %v1038_v1 = vpop.f32.mrb[0].mxu0 }
 0x131   : > { %v1082_v2 = vpop.f32.mrb[0].mxu1  ;;  %v1039_v3 = vpop.f32.mrb[1].mxu0 }
 0x132   : > { %v1083_v4 = vpop.f32.mrb[1].mxu1  ;;  %v1040_v5 = vadd.f32 %v1039_v3, %v1038_v1 }
 0x133   : > { %v1084_v6 = vadd.f32 %v1083_v4, %v1082_v2 }
 0x134   : > { %v1041_v7 = vpop.f32.mrb[2].mxu0 }
 0x135   : > { %v1085_v8 = vpop.f32.mrb[2].mxu1  ;;  %v538_v9 = vadd.f32 %v1084_v6, %v1040_v5  ;;  %v1042_v10 = vpop.f32.mrb[3].mxu0  ;;  %v683_v6 = vlaneseq }
 0x136   : > { %v1086_v11 = vpop.f32.mrb[3].mxu1  ;;  %v1043_v12 = vadd.f32 %v1042_v10, %v1041_v7 }
 0x137   : > { %v1087_v13 = vadd.f32 %v1086_v11, %v1085_v8 }
 0x138   : > { %v1044_v14 = vpop.f32.mrb[4].mxu0 }
 0x139   : > { %v1088_v15 = vpop.f32.mrb[4].mxu1  ;;  %v543_v16 = vadd.f32 %v1087_v13, %v1043_v12  ;;  %v1045_v17 = vpop.f32.mrb[5].mxu0 }
 0x13a   : > { %v1089_v18 = vpop.f32.mrb[5].mxu1  ;;  %v1046_v19 = vadd.f32 %v1045_v17, %v1044_v14 }
 0x13b   : > { %v1090_v20 = vadd.f32 %v1089_v18, %v1088_v15 }
 0x13c   : > { %v1047_v21 = vpop.f32.mrb[6].mxu0 }
 0x13d   : > { %v1091_v22 = vpop.f32.mrb[6].mxu1  ;;  %v548_v23 = vadd.f32 %v1090_v20, %v1046_v19  ;;  %v1048_v24 = vpop.f32.mrb[7].mxu0  ;;  %v802_v20 = vld [vmem:[%s189_s30] ss:$0 sm:$0xff] }
 0x13e   : > { %v1092_v25 = vpop.f32.mrb[7].mxu1  ;;  %v1049_v26 = vadd.f32 %v1048_v24, %v1047_v21 }
 0x13f   : > { %v1093_v27 = vadd.f32 %v1092_v25, %v1091_v22 }
 0x141   : > { %v553_v28 = vadd.f32 %v1093_v27, %v1049_v26 }
 0x150   : > { %v1148_v29 = vpop.f32.mrb[8].mxu0 }
 0x151   : > { %v1151_v30 = vpop.f32.mrb[8].mxu1  ;;  %v1570_v31 = vadd.f32 %v1148_v29, %v543_v16  ;;  %v622_v33 = vpop.f32.mrb[9].mxu0 }
 0x152   : > { %v1572_v32 = vadd.f32 %v1151_v30, %v553_v28  ;;  %v632_v34 = vpop.f32.mrb[9].mxu1  ;;  %v623_v35 = vadd.f32 %v622_v33, %v538_v9  ;;  %v684_v9 = vshrl.u32 %v683_v6, 7 }
 0x153   : > { %v633_v36 = vadd.f32 %v632_v34, %v548_v23  ;;  %v651_v37 = vmul.f32 %v1570_v31, %v1570_v31 }
 0x154   : > { %v641_v38 = vadd.f32 %v1570_v31, %v623_v35  ;;  %v650_v39 = vmul.f32 %v623_v35, %v623_v35  ;;  %v653_v43 = vmul.f32 %v1572_v32, %v1572_v32  ;;  %v685_v11 = vsub.s32 0, %v684_v9 }
 0x155   : > { %v652_v42 = vmul.f32 %v633_v36, %v633_v36  ;;  %v695_v13 = vsub.s32 1, %v684_v9 }
 0x156   : > { %v654_v40 = vadd.f32 %v651_v37, %v650_v39  ;;  %v642_v41 = vadd.f32 %v641_v38, %v633_v36 }
 0x158   : > { %v643_v44 = vadd.f32 %v642_v41, %v1572_v32  ;;  %v655_v45 = vadd.f32 %v654_v40, %v652_v42 }
 0x15a   : > { %v644_v46 = vrot.slane %v643_v44, 4  ;;  %v656_v47 = vadd.f32 %v655_v45, %v653_v43 }
 0x15c   : > { %v645_v48 = vadd.f32 %v644_v46, %v643_v44  ;;  %v657_v49 = vrot.slane %v656_v47, 4 }
 0x15e   : > { %v646_v50 = vrot.slane %v645_v48, 2  ;;  %v658_v51 = vadd.f32 %v657_v49, %v656_v47 }
 0x160   : > { %v647_v52 = vadd.f32 %v646_v50, %v645_v48  ;;  %v659_v53 = vrot.slane %v658_v51, 2 }
 0x162   : > { %v648_v54 = vrot.slane %v647_v52, 1  ;;  %v660_v55 = vadd.f32 %v659_v53, %v658_v51 }
 0x164   : > { %v661_v56 = vrot.slane %v660_v55, 1  ;;  %v649_v57 = vadd.f32 %v648_v54, %v647_v52 }
 0x166   : > { %v662_v58 = vadd.f32 %v661_v56, %v660_v55 }
 0x168   : > { %v664_v59 = vsel %vm663_vm0, %v649_v57, %v662_v58 }
 0x169   : > { %665 = vrot.lane.b32.xlu0 %v664_v59, %s1393_s11 }
 0x1db   : > { %v666_v60 = vpop.permute.xlu0 %665 }
 0x1dc   : > { %v667_v61 = vadd.f32 %v666_v60, %v664_v59 }
 0x1de   : > { %668 = vrot.lane.b32.xlu0 %v667_v61, %s1394_s12 }
 0x250   : > { %v669_v62 = vpop.permute.xlu0 %668 }
 0x251   : > { %v670_v63 = vadd.f32 %v669_v62, %v667_v61 }
 0x253   : > { %671 = vrot.lane.b32.xlu1 %v670_v63, %s1395_s18 }
 0x2c5   : > { %v672_v0 = vpop.permute.xlu1 %671 }
 0x2c6   : > { %v673_v1 = vadd.f32 %v672_v0, %v670_v63 }
 0x2c8   : > { %674 = vrot.lane.b32.xlu1 %v673_v1, %s1396_s19 }
 0x33a   : > { %v675_v2 = vpop.permute.xlu1 %674 }
 0x33b   : > { %v676_v3 = vadd.f32 %v675_v2, %v673_v1 }
 0x33d   : > { %v677_v4 = vmul.f32 0.001953125, %v676_v3 }
 0x33f   : > { %v678_v5 = vmul.f32 %v677_v4, %v677_v4  ;;  %v686_v12 = vrot.slane %v677_v4, %v685_v11 }
 0x341   : > { %v680_v7 = vrot.slane %v678_v5, 7  ;;  %v687_v15 = vsub.f32 %v623_v35, %v686_v12  ;;  %v688_v16 = vsub.f32 %v1570_v31, %v686_v12  ;;  %v689_v17 = vsub.f32 %v633_v36, %v686_v12 }
 0x342   : > { %v690_v18 = vsub.f32 %v1572_v32, %v686_v12 }
 0x343   : > { %v682_v8 = vsub.f32 %v677_v4, %v680_v7 }
 0x345   : > { %v691_v10 = vadd.f32 1e-05, %v682_v8 }
 0x347   : > { %1313 = vrsqrt.f32 %v691_v10 }
 0x351   : > { %v1314_v14 = vpop.eup %1313 }
 0x352   : > { %v696_v19 = vrot.slane %v1314_v14, %v695_v13 }
 0x354   : > { %v697_v21 = vmul.f32 %v696_v19, %v687_v15  ;;  %v698_v22 = vmul.f32 %v696_v19, %v688_v16  ;;  %v699_v23 = vmul.f32 %v696_v19, %v689_v17  ;;  %v700_v24 = vmul.f32 %v696_v19, %v690_v18 }
 0x356   : > { %v708_v25 = vadd.f32 %v802_v20, %v697_v21  ;;  %v709_v26 = vadd.f32 %v802_v20, %v698_v22  ;;  %v710_v27 = vadd.f32 %v802_v20, %v699_v23  ;;  %v711_v28 = vadd.f32 %v802_v20, %v700_v24 }
 0x358   : > { %v716_v29 = vmul.f32 0.70710677, %v708_v25  ;;  %v717_v30 = vmul.f32 0.70710677, %v709_v26  ;;  %v718_v31 = vmul.f32 0.70710677, %v710_v27 }
 0x359   : > { %v719_v33 = vmul.f32 0.70710677, %v711_v28  ;;  %v712_v35 = vmul.f32 0.5, %v708_v25  ;;  %v713_v38 = vmul.f32 0.5, %v709_v26  ;;  %v714_v41 = vmul.f32 0.5, %v710_v27 }
 0x35a   : > { %1315 = verf.f32 %v716_v29  ;;  %v715_v44 = vmul.f32 0.5, %v711_v28 }
 0x35b   : > { %1317 = verf.f32 %v717_v30 }
 0x35c   : > { %1319 = verf.f32 %v718_v31 }
 0x35d   : > { %1321 = verf.f32 %v719_v33 }
 0x364   : > { %v1316_v32 = vpop.eup %1315  ;;  %735 = sbr.rel (%p803_p7) target bundleno = 877 (0x36d), region = 44 }
 0x365   : > { %v1318_v34 = vpop.eup %1317  ;;  %v724_v36 = vadd.f32 1.0, %v1316_v32 }
 0x366   : > { %v1320_v37 = vpop.eup %1319  ;;  %v725_v39 = vadd.f32 1.0, %v1318_v34 }
 0x367   : > { %v1322_v40 = vpop.eup %1321  ;;  %v726_v42 = vadd.f32 1.0, %v1320_v37  ;;  %v728_v43 = vmul.f32 %v724_v36, %v712_v35 }
 0x368   : > { %v727_v45 = vadd.f32 1.0, %v1322_v40  ;;  %v729_v46 = vmul.f32 %v725_v39, %v713_v38 }
 0x369   : > { %v730_v47 = vmul.f32 %v726_v42, %v714_v41  ;;  %736 = vst [vmem:[%s1617_s3] sm:$0xff] (!%p803_p7), %v728_v43 }
 0x36a   : > { %v731_v48 = vmul.f32 %v727_v45, %v715_v44  ;;  %737 = vst [vmem:[%s1617_s3 + $0x8] sm:$0xff] (!%p803_p7), %v729_v46 }
 0x36b   : > { %738 = vst [vmem:[%s1617_s3 + $0x10] sm:$0xff] %v730_v47 }
 0x36c   : > { %739 = vst [vmem:[%s1617_s3 + $0x18] sm:$0xff] %v731_v48 }
 0x36d PF: > { %p804_p4 = scmp.ge.s32.totalorder %s1436_s16, 2 }
 0x36e   : > { %744 = vst [vmem:[#allocation2 + $0x2] sm:$0xff] (!%p804_p4), %v728_v43  ;;  %745 = vst [vmem:[#allocation2 + $0xa] sm:$0xff] (!%p804_p4), %v729_v46 }
 0x36f   : > { %743 = sbr.rel (%p804_p4) target bundleno = 886 (0x376), region = 48  ;;  %746 = vst [vmem:[#allocation2 + $0x1a] sm:$0xff] (!%p804_p4), %v730_v47  ;;  %747 = vst [vmem:[#allocation2 + $0x22] sm:$0xff] (!%p804_p4), %v731_v48 }
 0x376 PF: > { %p13_p5 = scmp.ge.s32.totalorder %s1439_s17, 5   ;;  %s1621_s12 = smov %s1379_s13 }
 0x377   : > { %s1622_s13 = smov %s1383_s14  ;;  %s1623_s14 = smov %s1449_s20 }
 0x378   : > { %s1624_s15 = smov %s1439_s17  ;;  %15 = sbr.rel (!%p13_p5) target bundleno = 3 (0x3), region = 83 }
 0x37f   :  { %759 = vsyncpa [#allocation4], 1 }
 0x380   :  { %761 = vsyncpa [#allocation4 + $0x1], 1 }

</bundles_post_ra>
